<compile_context>
chip_gen: v6e
topology: v6e:2x2x1
jax: 0.10.0
libtpu: 0.0.40
codegen_flags: <defaults>
</compile_context>

<pallas_src>
import functools

import jax
import jax.numpy as jnp
from jax.experimental import pallas as pl
from jax.experimental.pallas import tpu as pltpu

NEG_BIG = -9e15                       # pyGAT's zero_vec value


def _pick_vmem_limit():
    # ~80% of physical VMEM (v5e/v6e: 128 MiB -> ~102 MiB, v7x: 64 MiB -> ~51 MiB),
    # conservative 48 MiB fallback if the hardware query is unavailable.
    try:
        cap = int(pltpu.get_tpu_info().vmem_capacity_bytes)
        return min(int(cap * 0.8), 112 * 1024 * 1024)
    except Exception:
        return 48 * 1024 * 1024


VMEM_LIMIT = _pick_vmem_limit()


def _elu(x):
    # clamp the exp argument so the inactive branch never produces inf
    return jnp.where(x > 0, x, jnp.exp(jnp.minimum(x, 0.0)) - 1.0)


def _softmax_parts(e, exp_dtype):
    """Unnormalized softmax numerator p and f32 row-sum l.

    Normalization is applied *after* the value matmul: (p @ V) * 1/l, which turns
    a (TQ, N) multiply into a (TQ, nhid) multiply."""
    e = e - jnp.max(e, axis=1, keepdims=True)
    p = jnp.exp(e.astype(exp_dtype))
    l = jnp.sum(p.astype(jnp.float32), axis=1, keepdims=True)
    return p, l


# ---------------------------------------------------------------------------
# Kernel 1: batched projection  Y = X @ W   (per-head W's concatenated along
# the output axis -> one lane-filling MXU matmul; also reused for the output
# layer projection h_cat @ W_out, hoisted out of the attention grid).
# ---------------------------------------------------------------------------
def _proj_kernel(x_ref, w_ref, o_ref):
    o_ref[...] = jnp.dot(x_ref[...], w_ref[...],
                         preferred_element_type=jnp.float32).astype(o_ref.dtype)


def gat_project(x, w, *, row_tile=None, out_dtype=jnp.float32):
    n, f_in = x.shape
    f_out = w.shape[1]
    tm = n if row_tile is None else min(row_tile, n)
    assert n % tm == 0, "N must be divisible by row_tile"
    if tm < n:
        assert tm % 8 == 0, "row_tile must be a multiple of 8"
    return pl.pallas_call(
        _proj_kernel,
        out_shape=jax.ShapeDtypeStruct((n, f_out), out_dtype),
        grid=(n // tm,),
        in_specs=[
            pl.BlockSpec((tm, f_in), lambda m: (m, 0)),
            pl.BlockSpec((f_in, f_out), lambda m: (0, 0)),
        ],
        out_specs=pl.BlockSpec((tm, f_out), lambda m: (m, 0)),
        compiler_params=pltpu.CompilerParams(
            dimension_semantics=("parallel",),
            vmem_limit_bytes=VMEM_LIMIT),
    )(x, w)


# ---------------------------------------------------------------------------
# Kernel 2: hidden layer attention, all heads, one q-row tile per grid step.
# Logits src/dst are precomputed (q-independent); writes directly into the
# torch.cat(dim=1) layout (N, nheads*nhid), one column slab per head.
# ---------------------------------------------------------------------------
def _gat_hidden_kernel(adj_ref, src_ref, dst_ref, wh_ref, out_ref, *,
                       alpha, nheads, nhid, matmul_dtype, exp_dtype):
    adj = adj_ref[...]                                    # (TQ, N) int8
    # adjacency mask as an additive bias, computed once per tile for all heads
    bias = jnp.where(adj > 0, jnp.float32(0.0), jnp.float32(NEG_BIG))
    src = src_ref[...]                                    # (TQ, H)  f32
    dst = dst_ref[...]                                    # (H, N)   f32 (resident)
    wh = wh_ref[...]                                      # (N, H*nhid) matmul_dtype

    for h in range(nheads):                               # static unroll over heads
        s = src[:, h:h + 1] + dst[h:h + 1, :]             # (TQ, N)
        e = jnp.maximum(s, alpha * s) + bias               # leaky_relu + mask, 2 VPU ops
        p, l = _softmax_parts(e, exp_dtype)
        wh_h = wh[:, h * nhid:(h + 1) * nhid]              # static slice (N, nhid)
        hp = jnp.dot(p.astype(matmul_dtype), wh_h.astype(matmul_dtype),
                     preferred_element_type=jnp.float32)   # (TQ, nhid)
        hp = hp * pl.reciprocal(l, approx=True)            # normalize post-matmul (EUP)
        # TODO(synk): attention dropout skipped (eval mode -> identity)
        out_ref[:, h * nhid:(h + 1) * nhid] = _elu(hp).astype(out_ref.dtype)


def gat_hidden(adj_i8, wh_all, src, dst, *, alpha, nheads, nhid,
               q_tile=None, matmul_dtype=jnp.bfloat16, exp_dtype=jnp.float32,
               out_dtype=None):
    n = adj_i8.shape[0]
    hf = wh_all.shape[1]
    out_dtype = matmul_dtype if out_dtype is None else out_dtype
    tq = n if q_tile is None else min(q_tile, n)
    assert n % tq == 0, "N must be divisible by q_tile"
    if tq < n:
        assert tq % 32 == 0, "q_tile must be a multiple of 32 (int8 adj packing)"
    kernel = functools.partial(_gat_hidden_kernel, alpha=alpha, nheads=nheads,
                               nhid=nhid, matmul_dtype=matmul_dtype,
                               exp_dtype=exp_dtype)
    return pl.pallas_call(
        kernel,
        out_shape=jax.ShapeDtypeStruct((n, hf), out_dtype),
        grid=(n // tq,),
        in_specs=[
            pl.BlockSpec((tq, n), lambda q: (q, 0)),        # adj row slab (int8)
            pl.BlockSpec((tq, nheads), lambda q: (q, 0)),   # src logits (tiled)
            pl.BlockSpec((nheads, n), lambda q: (0, 0)),    # dst logits (resident)
            pl.BlockSpec((n, hf), lambda q: (0, 0)),        # Wh_all (resident, bf16)
        ],
        out_specs=pl.BlockSpec((tq, hf), lambda q: (q, 0)),
        compiler_params=pltpu.CompilerParams(
            dimension_semantics=("parallel",),              # q tiles shard across TCs
            vmem_limit_bytes=VMEM_LIMIT),
    )(adj_i8, src, dst, wh_all)


# ---------------------------------------------------------------------------
# Kernel 3: output attention layer (concat=False) + outer elu + log_softmax(dim=1).
# Projection wh = h_cat @ W_out and its logits are hoisted outside the grid.
# ---------------------------------------------------------------------------
def _gat_out_kernel(adj_ref, src_ref, dst_ref, wh_ref, out_ref, *,
                    alpha, matmul_dtype, exp_dtype):
    adj = adj_ref[...]                                    # (TQ, N) int8
    bias = jnp.where(adj > 0, jnp.float32(0.0), jnp.float32(NEG_BIG))
    s = src_ref[...] + dst_ref[...]                        # (TQ,1)+(1,N) -> (TQ, N)
    e = jnp.maximum(s, alpha * s) + bias
    p, l = _softmax_parts(e, exp_dtype)
    hp = jnp.dot(p.astype(matmul_dtype), wh_ref[...].astype(matmul_dtype),
                 preferred_element_type=jnp.float32)       # (TQ, C)
    y = _elu(hp * pl.reciprocal(l, approx=True))           # F.elu(out_att(...))

    # log_softmax along dim=1 (classes) — exact math, C is tiny
    m = jnp.max(y, axis=1, keepdims=True)
    lse = m + jnp.log(jnp.sum(jnp.exp(y - m), axis=1, keepdims=True))
    out_ref[...] = (y - lse).astype(out_ref.dtype)


def gat_out(adj_i8, wh_out, src_o, dst_o, *, alpha, q_tile=None,
            matmul_dtype=jnp.bfloat16, exp_dtype=jnp.float32):
    n = adj_i8.shape[0]
    nclass = wh_out.shape[1]
    tq = n if q_tile is None else min(q_tile, n)
    assert n % tq == 0, "N must be divisible by q_tile"
    if tq < n:
        assert tq % 32 == 0, "q_tile must be a multiple of 32 (int8 adj packing)"
    kernel = functools.partial(_gat_out_kernel, alpha=alpha,
                               matmul_dtype=matmul_dtype, exp_dtype=exp_dtype)
    return pl.pallas_call(
        kernel,
        out_shape=jax.ShapeDtypeStruct((n, nclass), jnp.float32),
        grid=(n // tq,),
        in_specs=[
            pl.BlockSpec((tq, n), lambda q: (q, 0)),        # adj row slab (int8)
            pl.BlockSpec((tq, 1), lambda q: (q, 0)),        # src logits (tiled)
            pl.BlockSpec((1, n), lambda q: (0, 0)),         # dst logits (resident)
            pl.BlockSpec((n, nclass), lambda q: (0, 0)),    # Wh_out (resident)
        ],
        out_specs=pl.BlockSpec((tq, nclass), lambda q: (q, 0)),
        compiler_params=pltpu.CompilerParams(
            dimension_semantics=("parallel",),
            vmem_limit_bytes=VMEM_LIMIT),
    )(adj_i8, src_o, dst_o, wh_out)


# ---------------------------------------------------------------------------
# Full GAT forward (eval mode: dropouts are identity).
#   adj_i8: int8 0/1 adjacency with self-loops. If rows are padded so N % q_tile
#   == 0, padded adjacency COLUMNS must be zero so real rows never attend to
#   padding (padded rows then get uniform attention, which is discarded).
#   q_tile guidance: 128-256 on v7x, 256-1024 on v5e/v6e (multiple of 32).
#   matmul_dtype=bf16 recommended on all generations; exp_dtype=bf16 additionally
#   on v6e/v7x (NOT v5e: no bf16 EUP). Softmax uses an approximate reciprocal,
#   so attention rows sum to ~1 (within EUP approx error).
# ---------------------------------------------------------------------------
def gat_forward(x, adj_i8, params, *, alpha, q_tile=None,
                matmul_dtype=jnp.bfloat16, exp_dtype=jnp.float32):
    assert 0.0 < alpha < 1.0  # required for the max(s, alpha*s) leaky-relu form
    w_heads, a_heads, w_out, a_out = params
    nheads, f_in, nhid = w_heads.shape
    n = x.shape[0]

    # ---- one-time parameter prep + HBM-side casts (tiny, plain XLA) ----------
    # W_all[:, h*nhid:(h+1)*nhid] = W_h  -> one lane-filling batched projection.
    w_all = jnp.transpose(w_heads, (1, 0, 2)).reshape(f_in, nheads * nhid)
    x_md = x.astype(matmul_dtype)
    w_all_md = w_all.astype(matmul_dtype)

    # ---- layer 1 projection (emitted in matmul_dtype: halves resident VMEM) --
    wh_all = gat_project(x_md, w_all_md, row_tile=q_tile, out_dtype=matmul_dtype)

    # ---- attention logits, hoisted out of the q-tile grid (q-independent) ----
    wh_heads = wh_all.reshape(n, nheads, nhid)
    src = jnp.einsum('nhd,hd->nh', wh_heads, a_heads[:, 0, :],
                     preferred_element_type=jnp.float32)           # (N, H)
    dst = jnp.einsum('nhd,hd->hn', wh_heads, a_heads[:, 1, :],
                     preferred_element_type=jnp.float32)           # (H, N)

    h_cat = gat_hidden(adj_i8, wh_all, src, dst, alpha=alpha, nheads=nheads,
                       nhid=nhid, q_tile=q_tile, matmul_dtype=matmul_dtype,
                       exp_dtype=exp_dtype)

    # ---- output layer projection + logits, hoisted out of the grid -----------
    wh_out = gat_project(h_cat, w_out.astype(matmul_dtype), row_tile=q_tile,
                         out_dtype=jnp.float32)                     # (N, C)
    src_o = (wh_out @ a_out[0])[:, None]                            # (N, 1)
    dst_o = (wh_out @ a_out[1])[None, :]                            # (1, N)

    return gat_out(adj_i8, wh_out, src_o, dst_o, alpha=alpha, q_tile=q_tile,
                   matmul_dtype=matmul_dtype, exp_dtype=exp_dtype)


# ---------------------------------------------------------------------------
# Pure-JAX reference (mirrors the torch module exactly) for validation.
# ---------------------------------------------------------------------------
def gat_reference(x, adj, params, *, alpha):
    w_heads, a_heads, w_out, a_out = params

    def layer(h, w, a1, a2):
        wh = h @ w
        e = wh @ a1[:, None] + (wh @ a2[:, None]).T
        e = jnp.where(e > 0, e, alpha * e)               # leaky_relu
        e = jnp.where(adj > 0, e, NEG_BIG)
        att = jax.nn.softmax(e, axis=1)
        return att @ wh

    heads = [jax.nn.elu(layer(x, w_heads[i], a_heads[i, 0], a_heads[i, 1]))
             for i in range(w_heads.shape[0])]
    h = jnp.concatenate(heads, axis=1)
    y = jax.nn.elu(layer(h, w_out, a_out[0], a_out[1]))
    return jax.nn.log_softmax(y, axis=1)


if __name__ == "__main__":
    # Small, forward-consistent shapes
    N, nfeat, nhid, nclass, nheads = 8, 16, 8, 4, 2
    alpha = 0.2

    key = jax.random.PRNGKey(0)
    kx, kadj, kw, ka, kwo, kao = jax.random.split(key, 6)

    x = jax.random.normal(kx, (N, nfeat), dtype=jnp.float32)

    # symmetric 0/1 adjacency with self-loops (keeps every row's softmax well-defined)
    raw = jax.random.bernoulli(kadj, 0.4, (N, N)).astype(jnp.float32)
    adj_f = jnp.clip(raw + raw.T + jnp.eye(N, dtype=jnp.float32), 0.0, 1.0)
    adj_i8 = (adj_f > 0).astype(jnp.int8)    # int8 mask: 4x less HBM/VMEM than f32

    # per-head W: (nheads, nfeat, nhid); per-head a stored as (nheads, 2, nhid)
    w_heads = 0.1 * jax.random.normal(kw, (nheads, nfeat, nhid), dtype=jnp.float32)
    a_heads = 0.1 * jax.random.normal(ka, (nheads, 2, nhid), dtype=jnp.float32)
    w_out = 0.1 * jax.random.normal(kwo, (nhid * nheads, nclass), dtype=jnp.float32)
    a_out = 0.1 * jax.random.normal(kao, (2, nclass), dtype=jnp.float32)
    params = (w_heads, a_heads, w_out, a_out)

    ref = gat_reference(x, adj_f, params, alpha=alpha)

    # f32 path (tight check; approx reciprocal -> slightly loosened tolerance)
    out_f32 = jax.block_until_ready(
        gat_forward(x, adj_i8, params, alpha=alpha,
                    matmul_dtype=jnp.float32, exp_dtype=jnp.float32))
    assert out_f32.shape == (N, nclass)
    assert jnp.allclose(out_f32, ref, rtol=2e-3, atol=2e-3), \
        "mismatch vs JAX reference (f32)"

    # bf16 MXU operands / bf16 Wh storage / bf16 exp (v6e/v7x recommended config)
    out_bf16 = jax.block_until_ready(
        gat_forward(x, adj_i8, params, alpha=alpha,
                    matmul_dtype=jnp.bfloat16, exp_dtype=jnp.bfloat16))
    assert jnp.allclose(out_bf16, ref, rtol=6e-2, atol=6e-2), \
        "mismatch vs JAX reference (bf16)"

    print("KERNEL_OK")
</pallas_src>

<mosaic_0001>
module attributes {stable_mosaic.version = 11 : i64} {
  func.func @_proj_kernel(%arg0: i32, %arg1: memref<8x16xf32, #tpu.memory_space<vmem>>, %arg2: memref<16x16xf32, #tpu.memory_space<vmem>>, %arg3: memref<8x16xf32, #tpu.memory_space<vmem>>) attributes {dimension_semantics = [#tpu.dimension_semantics<parallel>], iteration_bounds = array<i64: 1>, scalar_prefetch = 0 : i64, scratch_operands = 0 : i64, tpu.core_type = #tpu.core_type<tc>, window_params = [{transform_indices = @transform_0, window_bounds = array<i64: 8, 16>}, {pipeline_mode = #tpu.pipeline_mode<synchronous>, transform_indices = @transform_1, window_bounds = array<i64: 16, 16>}, {transform_indices = @transform_2, window_bounds = array<i64: 8, 16>}]} {
    %c0 = arith.constant 0 : index
    %c0_0 = arith.constant 0 : index
    %0 = vector.load %arg1[%c0, %c0_0] : memref<8x16xf32, #tpu.memory_space<vmem>>, vector<8x16xf32>
    %c0_1 = arith.constant 0 : index
    %c0_2 = arith.constant 0 : index
    %1 = vector.load %arg2[%c0_1, %c0_2] : memref<16x16xf32, #tpu.memory_space<vmem>>, vector<16x16xf32>
    %cst = arith.constant dense<0.000000e+00> : vector<8x16xf32>
    %2 = tpu.matmul %0, %1, %cst {dimension_numbers = #tpu.dot_dimension_numbers<[1], [0], [0], [1], [0, 0, 1, 1], [], []>} : vector<8x16xf32>, vector<16x16xf32>, vector<8x16xf32> -> vector<8x16xf32>
    %c0_3 = arith.constant 0 : index
    %c0_4 = arith.constant 0 : index
    %3 = vector.load %arg3[%c0_3, %c0_4] : memref<8x16xf32, #tpu.memory_space<vmem>>, vector<8x16xf32>
    tpu.vector_store %arg3[%c0_3, %c0_4], %2 {strides = array<i32>} : memref<8x16xf32, #tpu.memory_space<vmem>>, vector<8x16xf32>,
    return
  }
  func.func @transform_0(%arg0: i32) -> (i32, i32) {
    %c0_i32 = arith.constant 0 : i32
    %c0_i32_0 = arith.constant 0 : i32
    return %arg0, %c0_i32 : i32, i32
  }
  func.func @transform_1(%arg0: i32) -> (i32, i32) {
    %c0_i32 = arith.constant 0 : i32
    %c0_i32_0 = arith.constant 0 : i32
    %c0_i32_1 = arith.constant 0 : i32
    return %c0_i32, %c0_i32_0 : i32, i32
  }
  func.func @transform_2(%arg0: i32) -> (i32, i32) {
    %c0_i32 = arith.constant 0 : i32
    %c0_i32_0 = arith.constant 0 : i32
    return %arg0, %c0_i32 : i32, i32
  }
}

</mosaic_0001>

<bundles_post_ra>
// kernel: tpu_custom_call.1
= control target key start
LH: loop header
LB: loop body
LE: loop exit
PB: predicated region body
PF: predicated region fallthrough
CT: control target
= control target key end

     0   :  { %7 = vsyncpa [#allocation3], 0  ;;  %s247_s0 = inlined_call_operand.hbm [shape: f32[8,16], index: 0, kind: input, shape index: {}]   ;;  %s248_s1 = inlined_call_operand.hbm [shape: f32[16,16], index: 1, kind: input, shape index: {}]   ;;  %s249_s2 = inlined_call_operand.hbm [shape: f32[8,16], index: 2, kind: output, shape index: {}]  }
   0x1   :  { %8 = vsyncpa [#allocation6], 0 }
   0x2   :  { %9 = vsyncpa [#allocation4], 0  ;;  %s216_s9 = smov [#allocation2]   ;;  %s217_s11 = smov [#allocation5]  }
   0x3   :  { %s16_s10 = sshll.u32 %s216_s9, 4  ;;  %s25_s12 = sshll.u32 %s217_s11, 4  ;;  %s17_s10 = int_to_ptr.vmem [resolvable:$true] %s16_s10  ;;  %s26_s12 = int_to_ptr.vmem [resolvable:$true] %s25_s12 }
   0x4   :  { %s158_s13 = scalar_lea.vmem %s17_s10, 128  ;;  %p163_p1 = scmp.lt.s32.totalorder %s17_s10, %s17_s10 }
   0x5   :  { %p159_p0 = scmp.ne.s32.totalorder %s17_s10, %s158_s13  ;;  %p164_p2 = scmp.lt.s32.totalorder %s158_s13, %s158_s13 }
   0x7   :  { %p165_p3 = por %p164_p2, %p163_p1 }
   0x9   :  { %p166_p4 = pnand %p165_p3, %p159_p0 }
   0xb   :  { %169 = shalt.err (!%p166_p4)
}
   0xc   :  { %19 = dma.hbm_to_vmem [thread:$0]  %s247_s0, 128, %s17_s10, [#allocation3]  }
   0xd   :  { %s178_s16 = scalar_lea.vmem %s26_s12, 256  ;;  %p183_p6 = scmp.lt.s32.totalorder %s26_s12, %s26_s12 }
   0xe   :  { %p179_p5 = scmp.ne.s32.totalorder %s26_s12, %s178_s16  ;;  %p184_p7 = scmp.lt.s32.totalorder %s178_s16, %s178_s16 }
  0x10   :  { %p185_p8 = por %p184_p7, %p183_p6 }
  0x12   :  { %p186_p9 = pnand %p185_p8, %p179_p5 }
  0x14   :  { %189 = shalt.err (!%p186_p9)
}
  0x15   :  { %s218_s17 = smov 128   ;;  %s219_s18 = smov 8  }
  0x16   :  { %31 = dma.hbm_to_vmem [thread:$0]  %s248_s1, 256, %s26_s12, [#allocation6], %s218_s17, %s218_s17, %s219_s18  }
  0x17   :  { %210 = dma.done.wait [#allocation3], 128  }
  0x18   :  { %211 = vsyncadd [#allocation3], 4294967168 }
  0x19   :  { %212 = dma.done.wait [#allocation6], 256  }
  0x1a   :  { %213 = vsyncadd [#allocation6], 4294967040  ;;  %v220_v0 = vmov 0.0   ;;  %vm221_vm0 = vmmov 0   ;;  %v40_v1 = vld [vmem:[#allocation5 + $0x8] sm:$0xff]  ;;  %v39_v2 = vld [vmem:[#allocation5] sm:$0xff] }
  0x1b   :  { %136 = vmatprep.subr.mxu0 %v220_v0  ;;  %140 = vmatprep.mubr.msk.f32.mxu0 %vm221_vm0, %v220_v0  ;;  %v38_v3 = vld [vmem:[#allocation2] sm:$0xff]  ;;  %vm41_vm1 = vcmask 130048   ;;  %s222_s0 = smov [#allocation7]  }
  0x1c   :  { %137 = vmatpush3.msra.mxu0 %v40_v1  ;;  %s122_s21 = sshll.u32 %s222_s0, 4  ;;  %s123_s21 = int_to_ptr.vmem [resolvable:$true] %s122_s21 }
  0x1d   :  { %138 = vmatprep.subr.mxu0 %v220_v0  ;;  %s190_s1 = scalar_lea.vmem %s123_s21, 128  ;;  %p195_p11 = scmp.lt.s32.totalorder %s123_s21, %s123_s21 }
  0x1e   :  { %139 = vmatpush3.msra.mxu0 %v39_v2  ;;  %p191_p10 = scmp.ne.s32.totalorder %s123_s21, %s190_s1  ;;  %p196_p12 = scmp.lt.s32.totalorder %s190_s1, %s190_s1 }
  0x1f   :  { %141 = vmatmul.mubr.msk.f32.vlgmr.msra.gmra.mxu0 %vm41_vm1, %v38_v3 }
  0x20   :  { %p197_p13 = por %p196_p12, %p195_p11 }
  0x22   :  { %p198_p0 = pnand %p197_p13, %p191_p10 }
  0xdf   :  { %v111_v4 = vpop.f32.mrf.mxu0 }
  0xe0   :  { %115 = vst.msk [vmem:[#allocation7] sm:$0xff] %vm41_vm1, %v111_v4 }
  0xe1   :  { %v142_v5 = vpop.f32.mrf.mxu0 }
  0xe2   :  { %201 = shalt.err (!%p198_p0)
}
  0xe3   :  { %125 = dma.vmem_to_hbm [thread:$0]  %s123_s21, 128, %s249_s2, [#allocation4]  }
  0xe4   :  { %214 = dma.done.wait [#allocation4], 128  }
  0xe5   :  { %215 = vsyncadd [#allocation4], 4294967168 }
  0xe6   :  { %129 = vsyncpa [#allocation3], 1 }
  0xe7   :  { %130 = vsyncpa [#allocation6], 1 }
  0xe8   :  { %131 = vsyncpa [#allocation4], 1 }

</bundles_post_ra>
